<compile_context>
chip_gen: v5e
topology: v5e:2x2
jax: 0.10.0
libtpu: 0.0.40
codegen_flags: <defaults>
</compile_context>

<pallas_src>
import jax
import jax.numpy as jnp
from jax.experimental import pallas as pl
from jax.experimental.pallas import tpu as pltpu

ALPHA = 0.25
GAMMA = 2.0          # exponent == 2 -> implemented as an explicit square (no pow)

_PAD_LOGIT = -100.0  # padded elements: sigmoid ~ 0, modulating factor == 0 -> exactly 0 loss


def _focal_loss_kernel(pred_ref, true_ref, out_ref):
    x = pred_ref[...].astype(jnp.float32)
    y = true_ref[...].astype(jnp.float32)

    # Stable log-sigmoid chain: one exp + one log + one divide, instead of
    # sigmoid + 2x log + float pow (cuts EUP transcendentals ~5 -> 2 / element).
    e = jnp.exp(-x)                        # exp(-x)
    denom = 1.0 + e
    p = 1.0 / denom                        # sigmoid(x)
    log_p_raw = -jnp.log(denom)            # log(sigmoid(x))
    log_1mp_raw = log_p_raw - x            # log(1 - sigmoid(x))
    # PyTorch BCELoss clamps each log term at -100.
    log_p = jnp.maximum(log_p_raw, jnp.float32(-100.0))
    log_1mp = jnp.maximum(log_1mp_raw, jnp.float32(-100.0))

    ce = -(y * log_p + (1.0 - y) * log_1mp)           # BCE, reduction='none'
    alpha_w = y * ALPHA + (1.0 - y) * (1.0 - ALPHA)   # alpha weighting
    p_t = y * p + (1.0 - y) * (1.0 - p)
    m = 1.0 - p_t
    loss = (m * m) * alpha_w * ce                     # (1 - p_t)^2 as explicit square

    # Per-block partial sum folded to one (8, C) slab: pure vreg (VPU) adds,
    # no per-step scalar/SMEM read-modify-write serialization.  The reshape
    # only regroups whole (8, C) slabs, so it stays tile-aligned.
    r, c = loss.shape
    out_ref[...] = loss.reshape(r // 8, 8, c).sum(axis=0)


def focal_loss(y_pred, y_true, *, tile_rows=None, target_tile_bytes=2 << 20):
    """Mean focal loss over all elements, matching the PyTorch module's forward."""
    assert y_pred.shape == y_true.shape
    if y_pred.ndim != 2:
        lead = y_pred.shape[0] if y_pred.ndim > 1 else 1
        y_pred = y_pred.reshape(lead, -1)
        y_true = y_true.reshape(lead, -1)
    n, c = y_pred.shape
    total = n * c

    # Pad the class dim to a lane multiple (128) and rows to the tile size.
    c_pad = max(128, ((c + 127) // 128) * 128)
    n_up8 = ((n + 7) // 8) * 8
    if tile_rows is None:
        # ~2 MiB of f32 per input tile -> 2 inputs x 2 pipeline buffers ~ 8 MiB VMEM.
        tile_rows = max(8, (target_tile_bytes // (c_pad * 4)) // 8 * 8)
    tile_rows = int(max(8, (min(tile_rows, n_up8) // 8) * 8))
    num_tiles = pl.cdiv(n, tile_rows)
    n_pad = num_tiles * tile_rows
    # TODO(synk): for extremely wide C (single 8-row tile exceeding the VMEM budget) also tile C.

    if (n_pad, c_pad) != (n, c):
        # Padding with logit=-100 / target=0 contributes exactly 0 to the sum
        # (modulating factor (1-p_t)^2 == 0), so no in-kernel masking is needed.
        y_pred = jnp.pad(y_pred, ((0, n_pad - n), (0, c_pad - c)),
                         constant_values=_PAD_LOGIT)
        y_true = jnp.pad(y_true, ((0, n_pad - n), (0, c_pad - c)),
                         constant_values=0)

    partials = pl.pallas_call(
        _focal_loss_kernel,
        out_shape=jax.ShapeDtypeStruct((num_tiles * 8, c_pad), jnp.float32),
        grid_spec=pltpu.PrefetchScalarGridSpec(
            num_scalar_prefetch=0,
            grid=(num_tiles,),
            in_specs=[
                pl.BlockSpec((tile_rows, c_pad), lambda i: (i, 0)),
                pl.BlockSpec((tile_rows, c_pad), lambda i: (i, 0)),
            ],
            out_specs=pl.BlockSpec((8, c_pad), lambda i: (i, 0)),
        ),
        compiler_params=pltpu.CompilerParams(
            # Per-block partial sums are independent -> the row-tile axis can
            # shard across TensorCores (v7x megacore) and pipeline freely.
            dimension_semantics=("parallel",),
            vmem_limit_bytes=32 * 1024 * 1024,
        ),
    )(y_pred, y_true)

    # Tiny final reduction + mean outside the kernel.
    return jnp.sum(partials) / jnp.float32(total)


def focal_loss_ref(y_pred, y_true):
    """Pure-JAX reference mirroring the PyTorch forward."""
    p = jax.nn.sigmoid(y_pred.astype(jnp.float32))
    y = y_true.astype(jnp.float32)
    alpha_w = y * ALPHA + (1.0 - y) * (1.0 - ALPHA)
    p_t = y * p + (1.0 - y) * (1.0 - p)
    log_p = jnp.maximum(jnp.log(p), -100.0)
    log_1mp = jnp.maximum(jnp.log(1.0 - p), -100.0)
    ce = -(y * log_p + (1.0 - y) * log_1mp)
    mod = (1.0 - p_t) ** GAMMA
    return jnp.mean(mod * alpha_w * ce)


if __name__ == "__main__":
    key = jax.random.PRNGKey(0)
    k1, k2, k3, k4 = jax.random.split(key, 4)

    # Case 1: single aligned (8, 128) tile (batch=8, class_num=128).
    N, C = 8, 128
    y_pred = jax.random.normal(k1, (N, C), dtype=jnp.float32) * 2.0        # logits
    y_true = (jax.random.uniform(k2, (N, C)) > 0.5).astype(jnp.float32)    # {0,1} targets
    out = jax.block_until_ready(focal_loss(y_pred, y_true))
    ref = focal_loss_ref(y_pred, y_true)
    assert jnp.allclose(out, ref, rtol=1e-4, atol=1e-6), (out, ref)

    # Case 2: ragged shape + multi-block grid (exercises padding and the
    # per-block partial-sum / parallel path).
    N2, C2 = 22, 100
    y_pred2 = jax.random.normal(k3, (N2, C2), dtype=jnp.float32) * 3.0
    y_true2 = (jax.random.uniform(k4, (N2, C2)) > 0.5).astype(jnp.float32)
    out2 = jax.block_until_ready(focal_loss(y_pred2, y_true2, tile_rows=8))
    ref2 = focal_loss_ref(y_pred2, y_true2)
    assert jnp.allclose(out2, ref2, rtol=1e-4, atol=1e-6), (out2, ref2)

    print("KERNEL_OK")
</pallas_src>

<mosaic_0001>
module attributes {stable_mosaic.version = 11 : i64} {
  func.func @_focal_loss_kernel(%arg0: i32, %arg1: memref<8x128xf32, #tpu.memory_space<vmem>>, %arg2: memref<8x128xf32, #tpu.memory_space<vmem>>, %arg3: memref<8x128xf32, #tpu.memory_space<vmem>>) attributes {dimension_semantics = [#tpu.dimension_semantics<parallel>], iteration_bounds = array<i64: 1>, scalar_prefetch = 0 : i64, scratch_operands = 0 : i64, tpu.core_type = #tpu.core_type<tc>, window_params = [{transform_indices = @transform_0, window_bounds = array<i64: 8, 128>}, {transform_indices = @transform_1, window_bounds = array<i64: 8, 128>}, {transform_indices = @transform_2, window_bounds = array<i64: 8, 128>}]} {
    %c0 = arith.constant 0 : index
    %c0_0 = arith.constant 0 : index
    %0 = vector.load %arg1[%c0, %c0_0] : memref<8x128xf32, #tpu.memory_space<vmem>>, vector<8x128xf32>
    %c0_1 = arith.constant 0 : index
    %c0_2 = arith.constant 0 : index
    %1 = vector.load %arg2[%c0_1, %c0_2] : memref<8x128xf32, #tpu.memory_space<vmem>>, vector<8x128xf32>
    %cst = arith.constant 0.000000e+00 : f32
    %2 = vector.broadcast %cst : f32 to vector<8x128xf32>
    %3 = arith.subf %2, %0 : vector<8x128xf32>
    %4 = math.exp %3 : vector<8x128xf32>
    %cst_3 = arith.constant 1.000000e+00 : f32
    %5 = vector.broadcast %cst_3 : f32 to vector<8x128xf32>
    %6 = arith.addf %5, %4 : vector<8x128xf32>
    %cst_4 = arith.constant 1.000000e+00 : f32
    %7 = vector.broadcast %cst_4 : f32 to vector<8x128xf32>
    %8 = arith.divf %7, %6 : vector<8x128xf32>
    %9 = math.log %6 : vector<8x128xf32>
    %cst_5 = arith.constant 0.000000e+00 : f32
    %10 = vector.broadcast %cst_5 : f32 to vector<8x128xf32>
    %11 = arith.subf %10, %9 : vector<8x128xf32>
    %12 = arith.subf %11, %0 : vector<8x128xf32>
    %cst_6 = arith.constant -1.000000e+02 : f32
    %13 = vector.broadcast %cst_6 : f32 to vector<8x128xf32>
    %14 = arith.maximumf %11, %13 : vector<8x128xf32>
    %cst_7 = arith.constant -1.000000e+02 : f32
    %15 = vector.broadcast %cst_7 : f32 to vector<8x128xf32>
    %16 = arith.maximumf %12, %15 : vector<8x128xf32>
    %17 = arith.mulf %1, %14 : vector<8x128xf32>
    %cst_8 = arith.constant 1.000000e+00 : f32
    %18 = vector.broadcast %cst_8 : f32 to vector<8x128xf32>
    %19 = arith.subf %18, %1 : vector<8x128xf32>
    %20 = arith.mulf %19, %16 : vector<8x128xf32>
    %21 = arith.addf %17, %20 : vector<8x128xf32>
    %cst_9 = arith.constant 0.000000e+00 : f32
    %22 = vector.broadcast %cst_9 : f32 to vector<8x128xf32>
    %23 = arith.subf %22, %21 : vector<8x128xf32>
    %cst_10 = arith.constant 2.500000e-01 : f32
    %24 = vector.broadcast %cst_10 : f32 to vector<8x128xf32>
    %25 = arith.mulf %1, %24 : vector<8x128xf32>
    %cst_11 = arith.constant 1.000000e+00 : f32
    %26 = vector.broadcast %cst_11 : f32 to vector<8x128xf32>
    %27 = arith.subf %26, %1 : vector<8x128xf32>
    %cst_12 = arith.constant 7.500000e-01 : f32
    %28 = vector.broadcast %cst_12 : f32 to vector<8x128xf32>
    %29 = arith.mulf %27, %28 : vector<8x128xf32>
    %30 = arith.addf %25, %29 : vector<8x128xf32>
    %31 = arith.mulf %1, %8 : vector<8x128xf32>
    %cst_13 = arith.constant 1.000000e+00 : f32
    %32 = vector.broadcast %cst_13 : f32 to vector<8x128xf32>
    %33 = arith.subf %32, %1 : vector<8x128xf32>
    %cst_14 = arith.constant 1.000000e+00 : f32
    %34 = vector.broadcast %cst_14 : f32 to vector<8x128xf32>
    %35 = arith.subf %34, %8 : vector<8x128xf32>
    %36 = arith.mulf %33, %35 : vector<8x128xf32>
    %37 = arith.addf %31, %36 : vector<8x128xf32>
    %cst_15 = arith.constant 1.000000e+00 : f32
    %38 = vector.broadcast %cst_15 : f32 to vector<8x128xf32>
    %39 = arith.subf %38, %37 : vector<8x128xf32>
    %40 = arith.mulf %39, %39 : vector<8x128xf32>
    %41 = arith.mulf %40, %30 : vector<8x128xf32>
    %42 = arith.mulf %41, %23 : vector<8x128xf32>
    %43 = vector.shape_cast %42 : vector<8x128xf32> to vector<1x8x128xf32>
    %cst_16 = arith.constant dense<0.000000e+00> : vector<8x128xf32>
    %44 = vector.multi_reduction <add>, %43, %cst_16 [0] : vector<1x8x128xf32> to vector<8x128xf32>
    %c0_17 = arith.constant 0 : index
    %c0_18 = arith.constant 0 : index
    %45 = vector.load %arg3[%c0_17, %c0_18] : memref<8x128xf32, #tpu.memory_space<vmem>>, vector<8x128xf32>
    tpu.vector_store %arg3[%c0_17, %c0_18], %44 {strides = array<i32>} : memref<8x128xf32, #tpu.memory_space<vmem>>, vector<8x128xf32>,
    return
  }
  func.func @transform_0(%arg0: i32) -> (i32, i32) {
    %c0_i32 = arith.constant 0 : i32
    %c0_i32_0 = arith.constant 0 : i32
    return %arg0, %c0_i32 : i32, i32
  }
  func.func @transform_1(%arg0: i32) -> (i32, i32) {
    %c0_i32 = arith.constant 0 : i32
    %c0_i32_0 = arith.constant 0 : i32
    return %arg0, %c0_i32 : i32, i32
  }
  func.func @transform_2(%arg0: i32) -> (i32, i32) {
    %c0_i32 = arith.constant 0 : i32
    %c0_i32_0 = arith.constant 0 : i32
    return %arg0, %c0_i32 : i32, i32
  }
}

</mosaic_0001>

<bundles_post_ra>
// kernel: tpu_custom_call.1
= control target key start
LH: loop header
LB: loop body
LE: loop exit
PB: predicated region body
PF: predicated region fallthrough
CT: control target
= control target key end

     0   :  { %7 = vsyncpa [#allocation3], 0  ;;  %s217_s0 = inlined_call_operand.hbm [shape: f32[8,128], index: 0, kind: input, shape index: {}]   ;;  %s218_s1 = inlined_call_operand.hbm [shape: f32[8,128], index: 1, kind: input, shape index: {}]   ;;  %s219_s2 = inlined_call_operand.hbm [shape: f32[8,128], index: 2, kind: output, shape index: {}]  }
   0x1   :  { %8 = vsyncpa [#allocation6], 0 }
   0x2   :  { %9 = vsyncpa [#allocation4], 0  ;;  %s15_s11 = sshll.u32 %s217_s0, 4  ;;  %s190_s12 = smov [#allocation2]   ;;  %s16_s11 = int_to_ptr.hbm [resolvable:$true] %s15_s11 }
   0x3   :  { %s17_s13 = sshll.u32 %s190_s12, 4  ;;  %s26_s16 = sshll.u32 %s218_s1, 4  ;;  %s18_s13 = int_to_ptr.vmem [resolvable:$true] %s17_s13  ;;  %s27_s16 = int_to_ptr.hbm [resolvable:$true] %s26_s16 }
   0x4   :  { %20 = dma.hbm_to_vmem [thread:$0]  %s16_s11, 128, %s18_s13, [#allocation3]  }
   0x5   :  { %s191_s17 = smov [#allocation5]  }
   0x6   :  { %s28_s18 = sshll.u32 %s191_s17, 4  ;;  %s29_s18 = int_to_ptr.vmem [resolvable:$true] %s28_s18 }
   0x7   :  { %31 = dma.hbm_to_vmem [thread:$0]  %s27_s16, 128, %s29_s18, [#allocation6]  }
   0x8   :  { %184 = dma.done.wait [#allocation3], 128  }
   0x9   :  { %185 = vsyncadd [#allocation3], 4294967168 }
   0xa   :  { %186 = dma.done.wait [#allocation6], 128  }
   0xb   :  { %187 = vsyncadd [#allocation6], 4294967168  ;;  %v40_v0 = vld [vmem:[#allocation2] sm:$0xff]  ;;  %v41_v14 = vld [vmem:[#allocation5] sm:$0xff]  ;;  %s192_s0 = smov [#allocation7]   ;;  %s92_s21 = sshll.u32 %s219_s2, 4  ;;  %s93_s21 = int_to_ptr.hbm [resolvable:$true] %s92_s21 }
   0xc   :  { %v42_v1 = vsub.f32 0.0, %v40_v0  ;;  %v68_v21 = vsub.f32 1.0, %v41_v14  ;;  %v72_v27 = vmul.f32 0.25, %v41_v14  ;;  %s90_s1 = sshll.u32 %s192_s0, 4  ;;  %s91_s1 = int_to_ptr.vmem [resolvable:$true] %s90_s1 }
   0xe   :  { %v43_v2 = vmul.f32 1.442695, %v42_v1  ;;  %v73_v28 = vmul.f32 0.75, %v68_v21 }
  0x10   :  { %106 = vpow2.f32 %v43_v2  ;;  %v74_v32 = vadd.f32 %v73_v28, %v72_v27 }
  0x16   :  { %v107_v3 = vpop.eup %106 }
  0x17   :  { %v45_v4 = vadd.f32 1.0, %v107_v3 }
  0x19   :  { %108 = vrcp.f32 %v45_v4  ;;  %v57_v8 = vand.u32 2147483648, %v45_v4  ;;  %vm51_vm0 = vweird.f32 %v45_v4  ;;  %v55_v11 = vand.u32 2147483647, %v45_v4 }
  0x1a   :  { %110 = vlog2.f32 %v45_v4 }
  0x1b   :  { %v58_v15 = vor.u32 1.1754944e-38, %v57_v8  ;;  %vm56_vm3 = vcmp.eq.f32.partialorder %v55_v11, 8.507059e+37 }
  0x1f   :  { %v109_v5 = vpop.eup %108 }
  0x20   :  { %v111_v6 = vpop.eup %110  ;;  %v47_v7 = vmul.f32 %v109_v5, %v45_v4  ;;  %vm52_vm1 = vweird.f32 %v109_v5 }
  0x21   :  { %v62_v9 = vmul.f32 0.6931472, %v111_v6  ;;  %vm53_vm2 = vmor %vm51_vm0, %vm52_vm1 }
  0x22   :  { %v48_v10 = vsub.f32 1.0, %v47_v7 }
  0x23   :  { %v63_v12 = vsub.f32 0.0, %v62_v9 }
  0x24   :  { %v49_v13 = vmul.f32 %v109_v5, %v48_v10 }
  0x25   :  { %v64_v16 = vsub.f32 %v63_v12, %v40_v0  ;;  %v65_v18 = vmax.f32 %v63_v12, -100.0 }
  0x26   :  { %v50_v17 = vadd.f32 %v109_v5, %v49_v13 }
  0x27   :  { %v66_v19 = vmax.f32 %v64_v16, -100.0  ;;  %v67_v23 = vmul.f32 %v65_v18, %v41_v14 }
  0x28   :  { %v54_v20 = vsel %vm53_vm2, %v109_v5, %v50_v17 }
  0x29   :  { %v59_v22 = vsel %vm56_vm3, %v58_v15, %v54_v20  ;;  %v69_v24 = vmul.f32 %v68_v21, %v66_v19 }
  0x2a   :  { %v75_v25 = vmul.f32 %v59_v22, %v41_v14  ;;  %v76_v26 = vsub.f32 1.0, %v59_v22 }
  0x2b   :  { %v70_v30 = vadd.f32 %v69_v24, %v67_v23 }
  0x2c   :  { %v77_v29 = vmul.f32 %v76_v26, %v68_v21 }
  0x2d   :  { %v71_v34 = vsub.f32 0.0, %v70_v30 }
  0x2e   :  { %v78_v31 = vadd.f32 %v77_v29, %v75_v25 }
  0x30   :  { %v79_v33 = vsub.f32 1.0, %v78_v31 }
  0x32   :  { %v80_v35 = vmul.f32 %v79_v33, %v79_v33 }
  0x34   :  { %v81_v36 = vmul.f32 %v80_v35, %v74_v32 }
  0x36   :  { %v82_v37 = vmul.f32 %v81_v36, %v71_v34 }
  0x38   :  { %84 = vst [vmem:[#allocation7] sm:$0xff] %v82_v37 }
  0x39   :  { %95 = dma.vmem_to_hbm [thread:$0]  %s91_s1, 128, %s93_s21, [#allocation4]  }
  0x3a   :  { %188 = dma.done.wait [#allocation4], 128  }
  0x3b   :  { %189 = vsyncadd [#allocation4], 4294967168 }
  0x3c   :  { %100 = vsyncpa [#allocation3], 1 }
  0x3d   :  { %101 = vsyncpa [#allocation6], 1 }
  0x3e   :  { %102 = vsyncpa [#allocation4], 1 }

</bundles_post_ra>
